<compile_context>
chip_gen: v7x
topology: tpu7x:2x2x1
jax: 0.10.0
libtpu: 0.0.40
codegen_flags: <defaults>
</compile_context>

<pallas_src>
import functools

import jax
import jax.numpy as jnp
from jax.experimental import pallas as pl
from jax.experimental.pallas import tpu as pltpu

INPUT_SIZE = 784
HIDDEN = 50
NUM_CLASSES = 10

HIDDEN_PAD = 128    # 50  -> 128 (extra W1 columns / b1 entries are zero)
CLASSES_PAD = 128   # 10  -> 128 (extra W2 columns / b2 entries are zero)


def mlp_kernel(x_ref, w1_ref, b1_ref, w2_ref, b2_ref, out_ref):
    # x arrives as f32; pack to bf16 on the VPU (hidden under DMA/MXU) so HBM
    # only ever carries one f32 copy of x instead of f32 + a pre-cast bf16 copy.
    x_bf16 = x_ref[...].astype(jnp.bfloat16)
    # fc1: (TB,784)bf16 @ (784,128)bf16 -> f32 accumulator (MXU), bias + ReLU in f32 (VPU).
    h = jnp.dot(x_bf16, w1_ref[...], preferred_element_type=jnp.float32)
    h = jnp.maximum(h + b1_ref[...], 0.0)
    # Padded hidden lanes are exactly 0 (zero W1 cols, zero b1, ReLU(0)=0) and the
    # matching W2 rows are zero, so padding never changes the real logits.
    # fc2: cast activations back to bf16 for the MXU, accumulate in f32.
    o = jnp.dot(h.astype(w2_ref.dtype), w2_ref[...], preferred_element_type=jnp.float32)
    out_ref[...] = (o + b2_ref[...]).astype(out_ref.dtype)


def prepare_params(w1, b1, w2, b2, *, compute_dtype=jnp.bfloat16):
    """One-time canonicalization of PyTorch-style (out, in) weights:
    transpose to (in, out), zero-pad feature dims to 128 lanes, cast to bf16.
    Biases stay f32 (added on the f32 accumulator)."""
    w1_t = jnp.zeros((INPUT_SIZE, HIDDEN_PAD), compute_dtype)
    w1_t = w1_t.at[:, :HIDDEN].set(w1.T.astype(compute_dtype))             # (784, 128)
    w2_t = jnp.zeros((HIDDEN_PAD, CLASSES_PAD), compute_dtype)
    w2_t = w2_t.at[:HIDDEN, :NUM_CLASSES].set(w2.T.astype(compute_dtype))  # (128, 128)
    b1_p = jnp.zeros((1, HIDDEN_PAD), jnp.float32)
    b1_p = b1_p.at[0, :HIDDEN].set(b1.astype(jnp.float32))
    b2_p = jnp.zeros((1, CLASSES_PAD), jnp.float32)
    b2_p = b2_p.at[0, :NUM_CLASSES].set(b2.astype(jnp.float32))
    return w1_t, b1_p, w2_t, b2_p


def _pick_tb(B, tb):
    """Pick the batch tile. Prefer a multiple-of-8 tile that divides B so the
    wrapper never needs a jnp.pad pass over x; small / ragged batches run as a
    single block (block_shape == full array dims exemption)."""
    if B <= tb:
        return B
    start = (min(tb, B) // 8) * 8
    for cand in range(start, 7, -8):          # multiples of 8, largest first
        if B % cand == 0:
            return cand
    return min(tb, B)                         # rare fallback: pad below


def mlp_forward(x, params, *, tb=1024):
    """x: (B, 784) f32; params from prepare_params(). Returns (B, 10) f32 logits."""
    w1_t, b1_p, w2_t, b2_p = params
    B = x.shape[0]
    TB = _pick_tb(B, tb)
    num_blocks = pl.cdiv(B, TB)
    Bp = num_blocks * TB

    xin = x                                    # f32 straight into the kernel (no wrapper cast)
    if Bp != B:                                # only when B has no clean tile divisor
        xin = jnp.pad(xin, ((0, Bp - B), (0, 0)))

    out_pad = pl.pallas_call(
        mlp_kernel,
        out_shape=jax.ShapeDtypeStruct((Bp, CLASSES_PAD), jnp.float32),
        grid=(num_blocks,),
        in_specs=[
            pl.BlockSpec((TB, INPUT_SIZE), lambda i: (i, 0)),          # x tile streams (f32)
            pl.BlockSpec((INPUT_SIZE, HIDDEN_PAD), lambda i: (0, 0)),  # weights resident
            pl.BlockSpec((1, HIDDEN_PAD), lambda i: (0, 0)),
            pl.BlockSpec((HIDDEN_PAD, CLASSES_PAD), lambda i: (0, 0)),
            pl.BlockSpec((1, CLASSES_PAD), lambda i: (0, 0)),
        ],
        out_specs=pl.BlockSpec((TB, CLASSES_PAD), lambda i: (i, 0)),   # lane-dense stores
        compiler_params=pltpu.CompilerParams(
            dimension_semantics=("parallel",),   # shard batch tiles across v7x's 2 TCs
            vmem_limit_bytes=32 * 1024 * 1024,   # big TB fits even under v5e's scoped default
        ),
    )(xin, w1_t, b1_p, w2_t, b2_p)

    # TODO(synk): if a consumer follows (e.g. softmax/loss), fuse this slice there
    # instead of materializing (B,10) to skip the re-read of the padded logits.
    return out_pad[:B, :NUM_CLASSES]


def init_params(key):
    """Deterministic init mimicking PyTorch nn.Linear (uniform +/- 1/sqrt(fan_in))."""
    k1, k2, k3, k4 = jax.random.split(key, 4)
    bound1 = 1.0 / jnp.sqrt(INPUT_SIZE)
    bound2 = 1.0 / jnp.sqrt(HIDDEN)
    w1 = jax.random.uniform(k1, (HIDDEN, INPUT_SIZE), jnp.float32, -bound1, bound1)
    b1 = jax.random.uniform(k2, (HIDDEN,), jnp.float32, -bound1, bound1)
    w2 = jax.random.uniform(k3, (NUM_CLASSES, HIDDEN), jnp.float32, -bound2, bound2)
    b2 = jax.random.uniform(k4, (NUM_CLASSES,), jnp.float32, -bound2, bound2)
    return w1, b1, w2, b2


if __name__ == "__main__":
    key = jax.random.PRNGKey(0)
    kx, kp = jax.random.split(key)
    batch = 256
    x = jax.random.normal(kx, (batch, INPUT_SIZE), jnp.float32)
    w1, b1, w2, b2 = init_params(kp)

    params = prepare_params(w1, b1, w2, b2)          # one-time: pad/transpose/cast
    # tb=128 at B=256 -> grid=(2,): no pad pass, one tile per v7x TensorCore,
    # and only ~0.35 us of extra per-step overhead on single-TC v5e/v6e.
    fwd = jax.jit(functools.partial(mlp_forward, tb=128))
    out = fwd(x, params)
    jax.block_until_ready(out)
    assert out.shape == (batch, NUM_CLASSES)

    # Reference 1: same math as the kernel (bf16-rounded operands, f32 accumulation).
    f32 = lambda a: a.astype(jnp.bfloat16).astype(jnp.float32)
    h_ref = jnp.maximum(f32(x) @ f32(w1).T + b1, 0.0)
    ref_bf16 = f32(h_ref) @ f32(w2).T + b2
    assert jnp.allclose(out, ref_bf16, atol=1e-2, rtol=1e-2)

    # Reference 2: exact f32 PyTorch-semantics forward (loose tol for bf16 operands).
    ref_f32 = jnp.maximum(x @ w1.T + b1, 0.0) @ w2.T + b2
    assert jnp.allclose(out, ref_f32, atol=5e-2, rtol=5e-2)

    print("KERNEL_OK")
</pallas_src>

<mosaic_0001>
module attributes {stable_mosaic.version = 11 : i64} {
  func.func @mlp_kernel(%arg0: i32, %arg1: memref<128x784xf32, #tpu.memory_space<vmem>>, %arg2: memref<784x128xbf16, #tpu.memory_space<vmem>>, %arg3: memref<1x128xf32, #tpu.memory_space<vmem>>, %arg4: memref<128x128xbf16, #tpu.memory_space<vmem>>, %arg5: memref<1x128xf32, #tpu.memory_space<vmem>>, %arg6: memref<128x128xf32, #tpu.memory_space<vmem>>) attributes {dimension_semantics = [#tpu.dimension_semantics<parallel>], iteration_bounds = array<i64: 2>, scalar_prefetch = 0 : i64, scratch_operands = 0 : i64, tpu.core_type = #tpu.core_type<tc>, window_params = [{transform_indices = @transform_0, window_bounds = array<i64: 128, 784>}, {pipeline_mode = #tpu.pipeline_mode<synchronous>, transform_indices = @transform_1, window_bounds = array<i64: 784, 128>}, {pipeline_mode = #tpu.pipeline_mode<synchronous>, transform_indices = @transform_2, window_bounds = array<i64: 1, 128>}, {pipeline_mode = #tpu.pipeline_mode<synchronous>, transform_indices = @transform_3, window_bounds = array<i64: 128, 128>}, {pipeline_mode = #tpu.pipeline_mode<synchronous>, transform_indices = @transform_4, window_bounds = array<i64: 1, 128>}, {transform_indices = @transform_5, window_bounds = array<i64: 128, 128>}]} {
    %c0 = arith.constant 0 : index
    %c0_0 = arith.constant 0 : index
    %0 = vector.load %arg1[%c0, %c0_0] : memref<128x784xf32, #tpu.memory_space<vmem>>, vector<128x784xf32>
    %1 = arith.truncf %0 : vector<128x784xf32> to vector<128x784xbf16>
    %c0_1 = arith.constant 0 : index
    %c0_2 = arith.constant 0 : index
    %2 = vector.load %arg2[%c0_1, %c0_2] : memref<784x128xbf16, #tpu.memory_space<vmem>>, vector<784x128xbf16>
    %cst = arith.constant dense<0.000000e+00> : vector<128x128xf32>
    %3 = tpu.matmul %1, %2, %cst {dimension_numbers = #tpu.dot_dimension_numbers<[1], [0], [0], [1], [0, 0, 1, 1], [], []>} : vector<128x784xbf16>, vector<784x128xbf16>, vector<128x128xf32> -> vector<128x128xf32>
    %c0_3 = arith.constant 0 : index
    %c0_4 = arith.constant 0 : index
    %4 = vector.load %arg3[%c0_3, %c0_4] : memref<1x128xf32, #tpu.memory_space<vmem>>, vector<1x128xf32>
    %5 = vector.broadcast %4 : vector<1x128xf32> to vector<128x128xf32>
    %6 = arith.addf %3, %5 : vector<128x128xf32>
    %cst_5 = arith.constant 0.000000e+00 : f32
    %7 = vector.broadcast %cst_5 : f32 to vector<128x128xf32>
    %8 = arith.maximumf %6, %7 : vector<128x128xf32>
    %9 = arith.truncf %8 : vector<128x128xf32> to vector<128x128xbf16>
    %c0_6 = arith.constant 0 : index
    %c0_7 = arith.constant 0 : index
    %10 = vector.load %arg4[%c0_6, %c0_7] : memref<128x128xbf16, #tpu.memory_space<vmem>>, vector<128x128xbf16>
    %cst_8 = arith.constant dense<0.000000e+00> : vector<128x128xf32>
    %11 = tpu.matmul %9, %10, %cst_8 {dimension_numbers = #tpu.dot_dimension_numbers<[1], [0], [0], [1], [0, 0, 1, 1], [], []>} : vector<128x128xbf16>, vector<128x128xbf16>, vector<128x128xf32> -> vector<128x128xf32>
    %c0_9 = arith.constant 0 : index
    %c0_10 = arith.constant 0 : index
    %12 = vector.load %arg5[%c0_9, %c0_10] : memref<1x128xf32, #tpu.memory_space<vmem>>, vector<1x128xf32>
    %13 = vector.broadcast %12 : vector<1x128xf32> to vector<128x128xf32>
    %14 = arith.addf %11, %13 : vector<128x128xf32>
    %c0_11 = arith.constant 0 : index
    %c0_12 = arith.constant 0 : index
    %15 = vector.load %arg6[%c0_11, %c0_12] : memref<128x128xf32, #tpu.memory_space<vmem>>, vector<128x128xf32>
    tpu.vector_store %arg6[%c0_11, %c0_12], %14 {strides = array<i32>} : memref<128x128xf32, #tpu.memory_space<vmem>>, vector<128x128xf32>,
    return
  }
  func.func @transform_0(%arg0: i32) -> (i32, i32) {
    %c0_i32 = arith.constant 0 : i32
    %c0_i32_0 = arith.constant 0 : i32
    return %arg0, %c0_i32 : i32, i32
  }
  func.func @transform_1(%arg0: i32) -> (i32, i32) {
    %c0_i32 = arith.constant 0 : i32
    %c0_i32_0 = arith.constant 0 : i32
    %c0_i32_1 = arith.constant 0 : i32
    return %c0_i32, %c0_i32_0 : i32, i32
  }
  func.func @transform_2(%arg0: i32) -> (i32, i32) {
    %c0_i32 = arith.constant 0 : i32
    %c0_i32_0 = arith.constant 0 : i32
    %c0_i32_1 = arith.constant 0 : i32
    return %c0_i32, %c0_i32_0 : i32, i32
  }
  func.func @transform_3(%arg0: i32) -> (i32, i32) {
    %c0_i32 = arith.constant 0 : i32
    %c0_i32_0 = arith.constant 0 : i32
    %c0_i32_1 = arith.constant 0 : i32
    return %c0_i32, %c0_i32_0 : i32, i32
  }
  func.func @transform_4(%arg0: i32) -> (i32, i32) {
    %c0_i32 = arith.constant 0 : i32
    %c0_i32_0 = arith.constant 0 : i32
    %c0_i32_1 = arith.constant 0 : i32
    return %c0_i32, %c0_i32_0 : i32, i32
  }
  func.func @transform_5(%arg0: i32) -> (i32, i32) {
    %c0_i32 = arith.constant 0 : i32
    %c0_i32_0 = arith.constant 0 : i32
    return %arg0, %c0_i32 : i32, i32
  }
}

</mosaic_0001>

<bundles_post_ra>
// kernel: mlp_forward.1
= control target key start
LH: loop header
LB: loop body
LE: loop exit
PB: predicated region body
PF: predicated region fallthrough
CT: control target
= control target key end

     0   :  { %s1925_s18 = smov 0   ;;  %s2334_s0 = inlined_call_operand.vmem [shape: f32[256,784], index: 0, kind: input, shape index: {}]   ;;  %s2335_s1 = inlined_call_operand.vmem [shape: bf16[784,128], index: 1, kind: input, shape index: {}]   ;;  %s2336_s2 = inlined_call_operand.vmem [shape: f32[1,128], index: 2, kind: input, shape index: {}]   ;;  %s2337_s3 = inlined_call_operand.vmem [shape: bf16[128,128], index: 3, kind: input, shape index: {}]   ;;  %s2338_s4 = inlined_call_operand.vmem [shape: f32[1,128], index: 4, kind: input, shape index: {}]   ;;  %s2339_s5 = inlined_call_operand.vmem [shape: f32[256,128], index: 5, kind: output, shape index: {}]  }
   0x1 LB: > { %s1476_s19 = sadd.s32 4294967295, %s1893_s18   ;;  %p1480_p0 = scmp.ge.s32.totalorder %s1893_s18, 1  ;;  %s1893_s18 = sphi %s1925_s18, %s15_s18  }
   0x2   : > { %p189_p1 = scmp.lt.s32.totalorder %s1893_s18, 3 }
   0x4   : > { %p190_p2 = pnand %p1480_p0, %p189_p1 }
   0x5   : > { %v1830_v0 = vld [vmem:[%s2335_s1 + $0x40] sm:$0xff] (!%p190_p2)   ;;  %v1834_v4 = vld [vmem:[%s2335_s1 + $0x48] sm:$0xff] (!%p190_p2)   ;;  %v1838_v8 = vld [vmem:[%s2335_s1 + $0x50] sm:$0xff] (!%p190_p2)   ;;  %s1481_s25 = sshll.u32 (!%p190_p2), %s1476_s19, 4  ;;  %vm799_vm0 = vcmask (!%p190_p2), 130048  }
   0x6   : > { %193 = sbr.rel (%p190_p2) target bundleno = 601 (0x259), region = 40  ;;  %v1831_v1 = vld [vmem:[%s2335_s1] sm:$0xff] (!%p190_p2)   ;;  %1554 = vmatprep.subr.bf16.mxu0 (!%p190_p2), %v1830_v0  ;;  %v1835_v5 = vld [vmem:[%s2335_s1 + $0x8] sm:$0xff] (!%p190_p2)   ;;  %v1839_v9 = vld [vmem:[%s2335_s1 + $0x10] sm:$0xff] (!%p190_p2)   ;;  %p219_p3 = scmp.lt.s32.totalorder (!%p190_p2), %s1481_s25, 31 }
   0x7   : > { %v1832_v2 = vld [vmem:[%s2335_s1 + $0xc0] sm:$0xff] (!%p190_p2)   ;;  %1555 = vmatpush3.bf16.msra.mxu0 (!%p190_p2), %v1831_v1  ;;  %v1836_v6 = vld [vmem:[%s2335_s1 + $0xc8] sm:$0xff] (!%p190_p2)   ;;  %v1840_v10 = vld [vmem:[%s2335_s1 + $0xd0] sm:$0xff] (!%p190_p2)  }
   0x8   : > { %v1833_v3 = vld [vmem:[%s2335_s1 + $0x80] sm:$0xff] (!%p190_p2)   ;;  %1618 = vmatprep.subr.bf16.mxu1 (!%p190_p2), %v1832_v2  ;;  %1556 = vmatprep.subr.bf16.mxu0 (!%p190_p2), %v1834_v4  ;;  %v1837_v7 = vld [vmem:[%s2335_s1 + $0x88] sm:$0xff] (!%p190_p2)   ;;  %v1841_v11 = vld [vmem:[%s2335_s1 + $0x90] sm:$0xff] (!%p190_p2)  }
   0x9   : > { %1619 = vmatpush3.bf16.msra.mxu1 (!%p190_p2), %v1833_v3  ;;  %v1842_v12 = vld [vmem:[%s2335_s1 + $0x58] sm:$0xff] (!%p190_p2)   ;;  %v1846_v16 = vld [vmem:[%s2335_s1 + $0x60] sm:$0xff] (!%p190_p2)   ;;  %v1850_v20 = vld [vmem:[%s2335_s1 + $0x68] sm:$0xff] (!%p190_p2)  }
   0xa   : > { %1620 = vmatprep.subr.bf16.mxu1 (!%p190_p2), %v1836_v6  ;;  %v1843_v13 = vld [vmem:[%s2335_s1 + $0x18] sm:$0xff] (!%p190_p2)   ;;  %v1847_v17 = vld [vmem:[%s2335_s1 + $0x20] sm:$0xff] (!%p190_p2)   ;;  %v1851_v21 = vld [vmem:[%s2335_s1 + $0x28] sm:$0xff] (!%p190_p2)  }
   0xb   : > { %1557 = vmatpush3.bf16.msra.mxu0 (!%p190_p2), %v1835_v5  ;;  %v1844_v14 = vld [vmem:[%s2335_s1 + $0xd8] sm:$0xff] (!%p190_p2)   ;;  %v1848_v18 = vld [vmem:[%s2335_s1 + $0xe0] sm:$0xff] (!%p190_p2)   ;;  %v1852_v22 = vld [vmem:[%s2335_s1 + $0xe8] sm:$0xff] (!%p190_p2)  }
   0xc   : > { %1558 = vmatprep.subr.bf16.mxu0 (!%p190_p2), %v1838_v8  ;;  %v1845_v15 = vld [vmem:[%s2335_s1 + $0x98] sm:$0xff] (!%p190_p2)   ;;  %v1849_v19 = vld [vmem:[%s2335_s1 + $0xa0] sm:$0xff] (!%p190_p2)   ;;  %v1853_v23 = vld [vmem:[%s2335_s1 + $0xa8] sm:$0xff] (!%p190_p2)  }
   0xd   : > { %1621 = vmatpush3.bf16.msra.mxu1 %v1837_v7  ;;  %s2341_s25 = smov (!%p219_p3, %s1481_s25), 31  ;;  %v1854_v24 = vld [vmem:[%s2335_s1 + $0x70] sm:$0xff]   ;;  %v1858_v28 = vld [vmem:[%s2335_s1 + $0x78] sm:$0xff]   ;;  %v1862_v38 = vld [vmem:[%s2335_s1 + $0x140] sm:$0xff]  }
   0xe   : > { %1622 = vmatprep.subr.bf16.mxu1 %v1840_v10  ;;  %s1821_s24 = smul.u32 56, %s2341_s25  ;;  %v1855_v25 = vld [vmem:[%s2335_s1 + $0x30] sm:$0xff]   ;;  %v1859_v29 = vld [vmem:[%s2335_s1 + $0x38] sm:$0xff]   ;;  %v1863_v42 = vld [vmem:[%s2335_s1 + $0x100] sm:$0xff]   ;;  %s1484_s27 = sshll.u32 %s2341_s25, 3 }
   0xf   : > { %1559 = vmatpush3.bf16.msra.mxu0 %v1839_v9  ;;  %v1856_v26 = vld [vmem:[%s2335_s1 + $0xf0] sm:$0xff]   ;;  %v1860_v30 = vld [vmem:[%s2335_s1 + $0xf8] sm:$0xff]   ;;  %v1864_v51 = vld [vmem:[%s2335_s1 + $0x148] sm:$0xff]   ;;  %s2313_s7 = scalar_lea.vmem %s2339_s5, %s1484_s27 }
  0x10   : > { %1560 = vmatprep.subr.bf16.mxu0 %v1842_v12  ;;  %v1857_v27 = vld [vmem:[%s2335_s1 + $0xb0] sm:$0xff]   ;;  %s2028_s10 = scalar_lea.vmem %s2334_s0, %s1821_s24  ;;  %v1861_v34 = vld [vmem:[%s2335_s1 + $0xb8] sm:$0xff]   ;;  %v1865_v56 = vld [vmem:[%s2335_s1 + $0x108] sm:$0xff]  }
  0x11   : > { %1623 = vmatpush3.bf16.msra.mxu1 %v1841_v11  ;;  %v233_v31 = vld [vmem:[%s2028_s10 + $0x8] sm:$0xff]  ;;  %v240_v32 = vld [vmem:[%s2028_s10 + $0x40] sm:$0xff]  ;;  %v239_v36 = vld [vmem:[%s2028_s10 + $0x38] sm:$0xff] }
  0x12   : > { %1624 = vmatprep.subr.bf16.mxu1 %v1844_v14  ;;  %v345_v33 = vpack.c.bf16 %v240_v32, %v233_v31  ;;  %v232_v35 = vld [vmem:[%s2028_s10] sm:$0xff]  ;;  %v235_v39 = vld [vmem:[%s2028_s10 + $0x18] sm:$0xff]  ;;  %v242_v40 = vld [vmem:[%s2028_s10 + $0x50] sm:$0xff] }
  0x13   : > { %1561 = vmatpush3.bf16.msra.mxu0 %v1843_v13  ;;  %v344_v37 = vpack.c.bf16 %v239_v36, %v232_v35  ;;  %v347_v41 = vpack.c.bf16 %v242_v40, %v235_v39  ;;  %v234_v43 = vld [vmem:[%s2028_s10 + $0x10] sm:$0xff]  ;;  %v241_v44 = vld [vmem:[%s2028_s10 + $0x48] sm:$0xff]  ;;  %v247_v45 = vld [vmem:[%s2028_s10 + $0x78] sm:$0xff] }
  0x14   : > { %1562 = vmatprep.subr.bf16.mxu0 %v1846_v16  ;;  %856 = vmatprep.mubr.bf16.mxu0 %v345_v33  ;;  %v346_v46 = vpack.c.bf16 %v241_v44, %v234_v43  ;;  %v254_v47 = vld [vmem:[%s2028_s10 + $0xb0] sm:$0xff]  ;;  %v253_v49 = vld [vmem:[%s2028_s10 + $0xa8] sm:$0xff]  ;;  %v256_v53 = vld [vmem:[%s2028_s10 + $0xc0] sm:$0xff] }
  0x15   : > { %1625 = vmatpush3.bf16.msra.mxu1 %v1845_v15  ;;  %953 = vmatprep.mubr.bf16.mxu1 %v347_v41  ;;  %v246_v48 = vld [vmem:[%s2028_s10 + $0x70] sm:$0xff]  ;;  %v352_v50 = vpack.c.bf16 %v254_v47, %v247_v45  ;;  %v249_v52 = vld [vmem:[%s2028_s10 + $0x88] sm:$0xff]  ;;  %v248_v57 = vld [vmem:[%s2028_s10 + $0x80] sm:$0xff] }
  0x16   : > { %1626 = vmatprep.subr.bf16.mxu1 %v1848_v18  ;;  %v351_v54 = vpack.c.bf16 %v253_v49, %v246_v48  ;;  %v354_v55 = vpack.c.bf16 %v256_v53, %v249_v52  ;;  %v255_v58 = vld [vmem:[%s2028_s10 + $0xb8] sm:$0xff]  ;;  %v261_v59 = vld [vmem:[%s2028_s10 + $0xe8] sm:$0xff]  ;;  %v268_v60 = vld [vmem:[%s2028_s10 + $0x120] sm:$0xff] }
  0x17   : > { %1563 = vmatpush3.bf16.msra.mxu0 %v1847_v17  ;;  %v359_v61 = vpack.c.bf16 %v268_v60, %v261_v59  ;;  %v353_v62 = vpack.c.bf16 %v255_v58, %v248_v57  ;;  %v1866_v63 = vld [vmem:[%s2335_s1 + $0x150] sm:$0xff]   ;;  %v263_v0 = vld [vmem:[%s2028_s10 + $0xf8] sm:$0xff]  ;;  %v260_v2 = vld [vmem:[%s2028_s10 + $0xe0] sm:$0xff] }
  0x18   : > { %1564 = vmatprep.subr.bf16.mxu0 %v1850_v20  ;;  %v270_v1 = vld [vmem:[%s2028_s10 + $0x130] sm:$0xff]  ;;  %v267_v3 = vld [vmem:[%s2028_s10 + $0x118] sm:$0xff]  ;;  %v269_v9 = vld [vmem:[%s2028_s10 + $0x128] sm:$0xff] }
  0x19   : > { %1627 = vmatpush3.bf16.msra.mxu1 %v1849_v19  ;;  %v361_v4 = vpack.c.bf16 %v270_v1, %v263_v0  ;;  %v1867_v5 = vld [vmem:[%s2335_s1 + $0x110] sm:$0xff]   ;;  %v275_v7 = vld [vmem:[%s2028_s10 + $0x158] sm:$0xff]  ;;  %v358_v10 = vpack.c.bf16 %v267_v3, %v260_v2  ;;  %v277_v12 = vld [vmem:[%s2028_s10 + $0x168] sm:$0xff] }
  0x1a   : > { %1628 = vmatprep.subr.bf16.mxu1 %v1852_v22  ;;  %v262_v6 = vld [vmem:[%s2028_s10 + $0xf0] sm:$0xff]  ;;  %v1868_v11 = vld [vmem:[%s2335_s1 + $0x158] sm:$0xff]   ;;  %v284_v13 = vld [vmem:[%s2028_s10 + $0x1a0] sm:$0xff] }
  0x1b   : > { %1565 = vmatpush3.bf16.msra.mxu0 %v1851_v21  ;;  %v282_v8 = vld [vmem:[%s2028_s10 + $0x190] sm:$0xff]  ;;  %v1869_v15 = vld [vmem:[%s2335_s1 + $0x118] sm:$0xff]   ;;  %v360_v16 = vpack.c.bf16 %v269_v9, %v262_v6  ;;  %v368_v18 = vpack.c.bf16 %v284_v13, %v277_v12  ;;  %v1870_v19 = vld [vmem:[%s2335_s1 + $0x160] sm:$0xff]  }
  0x1c   : > { %1566 = vmatprep.subr.bf16.mxu0 %v1854_v24  ;;  %v366_v14 = vpack.c.bf16 %v282_v8, %v275_v7  ;;  %v274_v17 = vld [vmem:[%s2028_s10 + $0x150] sm:$0xff]  ;;  %v281_v20 = vld [vmem:[%s2028_s10 + $0x188] sm:$0xff]  ;;  %v296_v22 = vld [vmem:[%s2028_s10 + $0x200] sm:$0xff] }
  0x1d   : > { %1629 = vmatpush3.bf16.msra.mxu1 %v1853_v23  ;;  %v289_v21 = vld [vmem:[%s2028_s10 + $0x1c8] sm:$0xff]  ;;  %v1871_v23 = vld [vmem:[%s2335_s1 + $0x120] sm:$0xff]   ;;  %v365_v24 = vpack.c.bf16 %v281_v20, %v274_v17  ;;  %v295_v36 = vld [vmem:[%s2028_s10 + $0x1f8] sm:$0xff] }
  0x1e   : > { %1630 = vmatprep.subr.bf16.mxu1 %v1856_v26  ;;  %v283_v26 = vld [vmem:[%s2028_s10 + $0x198] sm:$0xff]  ;;  %v1873_v31 = vld [vmem:[%s2335_s1 + $0x168] sm:$0xff]   ;;  %v288_v35 = vld [vmem:[%s2028_s10 + $0x1c0] sm:$0xff] }
  0x1f   : > { %1567 = vmatpush3.bf16.msra.mxu0 %v1855_v25  ;;  %v276_v25 = vld [vmem:[%s2028_s10 + $0x160] sm:$0xff]  ;;  %v290_v39 = vld [vmem:[%s2028_s10 + $0x1d0] sm:$0xff]  ;;  %v297_v40 = vld [vmem:[%s2028_s10 + $0x208] sm:$0xff] }
  0x20   : > { %1568 = vmatprep.subr.bf16.mxu0 %v1858_v28  ;;  %v373_v28 = vpack.c.bf16 %v296_v22, %v289_v21  ;;  %v367_v32 = vpack.c.bf16 %v283_v26, %v276_v25  ;;  %v1875_v41 = vld [vmem:[%s2335_s1 + $0x170] sm:$0xff]   ;;  %v305_v45 = vld [vmem:[%s2028_s10 + $0x248] sm:$0xff]  ;;  %v374_v47 = vpack.c.bf16 %v297_v40, %v290_v39  ;;  %v1877_v48 = vld [vmem:[%s2335_s1 + $0x178] sm:$0xff]  }
  0x21   : > { %1631 = vmatpush3.bf16.msra.mxu1 %v1857_v27  ;;  %v1872_v27 = vld [vmem:[%s2335_s1 + $0x180] sm:$0xff]   ;;  %v1876_v43 = vld [vmem:[%s2335_s1 + $0x130] sm:$0xff]   ;;  %v1878_v52 = vld [vmem:[%s2335_s1 + $0x138] sm:$0xff]  }
  0x22   : > { %1632 = vmatprep.subr.bf16.mxu1 %v1860_v30  ;;  %v298_v30 = vld [vmem:[%s2028_s10 + $0x210] sm:$0xff]  ;;  %v317_v53 = vld [vmem:[%s2028_s10 + $0x2a8] sm:$0xff]  ;;  %v311_v57 = vld [vmem:[%s2028_s10 + $0x278] sm:$0xff] }
  0x23   : > { %1569 = vmatpush3.bf16.msra.mxu0 %v1859_v29  ;;  %v291_v29 = vld [vmem:[%s2028_s10 + $0x1d8] sm:$0xff]  ;;  %v302_v49 = vld [vmem:[%s2028_s10 + $0x230] sm:$0xff]  ;;  %v333_v7 = vld [vmem:[%s2028_s10 + $0x328] sm:$0xff] }
  0x24   : > { %1682 = vmatprep.subr.bf16.mxu0 %v1862_v38  ;;  %v375_v33 = vpack.c.bf16 %v298_v30, %v291_v29  ;;  %v310_v38 = vld [vmem:[%s2028_s10 + $0x270] sm:$0xff]  ;;  %v319_v59 = vld [vmem:[%s2028_s10 + $0x2b8] sm:$0xff]  ;;  %v340_v8 = vld [vmem:[%s2028_s10 + $0x360] sm:$0xff] }
  0x25   : > { %1633 = vmatpush3.bf16.msra.mxu1 %v1861_v34  ;;  %v1874_v34 = vld [vmem:[%s2335_s1 + $0x128] sm:$0xff]   ;;  %v326_v60 = vld [vmem:[%s2028_s10 + $0x2f0] sm:$0xff]  ;;  %v323_v0 = vld [vmem:[%s2028_s10 + $0x2d8] sm:$0xff] }
  0x26   : > { %857 = vmatmul.mubr.bf16.vlgmr.msra.gmra.mrb[0].mxu0 %v344_v37  ;;  %1771 = vmatprep.subr.bf16.mxu1 %v1872_v27  ;;  %v303_v37 = vld [vmem:[%s2028_s10 + $0x238] sm:$0xff]  ;;  %v338_v2 = vld [vmem:[%s2028_s10 + $0x350] sm:$0xff]  ;;  %v337_v12 = vld [vmem:[%s2028_s10 + $0x348] sm:$0xff] }
  0x27   : > { %1683 = vmatpush3.bf16.msra.mxu0 %v1863_v42  ;;  %864 = vmatprep.mubr.bf16.mxu0 %v352_v50  ;;  %v372_v42 = vpack.c.bf16 %v295_v36, %v288_v35  ;;  %v380_v44 = vpack.c.bf16 %v310_v38, %v303_v37  ;;  %v331_v1 = vld [vmem:[%s2028_s10 + $0x318] sm:$0xff]  ;;  %v237_v13 = vld [vmem:[%s2028_s10 + $0x28] sm:$0xff]  ;;  %v238_v17 = vld [vmem:[%s2028_s10 + $0x30] sm:$0xff] }
  0x28   : > { %954 = vmatmul.mubr.bf16.vlgmr.msra.gmra.mrb[0].mxu1 %v346_v46  ;;  %1684 = vmatprep.subr.bf16.mxu0 %v1864_v51  ;;  %v312_v46 = vld [vmem:[%s2028_s10 + $0x280] sm:$0xff]  ;;  %v309_v51 = vld [vmem:[%s2028_s10 + $0x268] sm:$0xff]  ;;  %v394_v6 = vpack.c.bf16 %v338_v2, %v331_v1  ;;  %v251_v25 = vld [vmem:[%s2028_s10 + $0x98] sm:$0xff] }
  0x29   : > { %961 = vmatprep.mubr.bf16.mxu1 %v354_v55  ;;  %1772 = vmatpush3.bf16.msra.mxu1 %v1872_v27  ;;  %v382_v50 = vpack.c.bf16 %v312_v46, %v305_v45  ;;  %v379_v55 = vpack.c.bf16 %v309_v51, %v302_v49  ;;  %v258_v26 = vld [vmem:[%s2028_s10 + $0xd0] sm:$0xff]  ;;  %v259_v29 = vld [vmem:[%s2028_s10 + $0xd8] sm:$0xff]  ;;  %v257_v36 = vld [vmem:[%s2028_s10 + $0xc8] sm:$0xff] }
  0x2a   : > { %v356_v30 = vpack.c.bf16 %v258_v26, %v251_v25  ;;  %v250_v35 = vld [vmem:[%s2028_s10 + $0x90] sm:$0xff]  ;;  %v265_v37 = vld [vmem:[%s2028_s10 + $0x108] sm:$0xff]  ;;  %v272_v38 = vld [vmem:[%s2028_s10 + $0x140] sm:$0xff] }
  0x2b   : > { %1685 = vmatpush3.bf16.msra.mxu0 %v1865_v56  ;;  %v304_v56 = vld [vmem:[%s2028_s10 + $0x240] sm:$0xff]  ;;  %v355_v39 = vpack.c.bf16 %v257_v36, %v250_v35  ;;  %v279_v49 = vld [vmem:[%s2028_s10 + $0x178] sm:$0xff]  ;;  %v1880_v26 = vld [vmem:[%s2337_s3 + $0x8] sm:$0xff]  }
  0x2c   : > { %1686 = vmatprep.subr.bf16.mxu0 %v1866_v63  ;;  %v316_v63 = vld [vmem:[%s2028_s10 + $0x2a0] sm:$0xff]  ;;  %v343_v1 = vld [vmem:[%s2028_s10 + $0x378] sm:$0xff] }
  0x2d   : > { %v386_v3 = vpack.c.bf16 %v323_v0, %v316_v63  ;;  %v280_v40 = vld [vmem:[%s2028_s10 + $0x180] sm:$0xff] }
  0x2e   : > { %865 = vmatmul.mubr.bf16.gmra.mrb[4].mxu0 %v351_v54  ;;  %v324_v54 = vld [vmem:[%s2028_s10 + $0x2e0] sm:$0xff] }
  0x2f   : > { %872 = vmatprep.mubr.bf16.mxu0 %v359_v61  ;;  %1687 = vmatpush3.bf16.msra.mxu0 %v1867_v5  ;;  %v387_v58 = vpack.c.bf16 %v324_v54, %v317_v53  ;;  %v381_v61 = vpack.c.bf16 %v311_v57, %v304_v56  ;;  %v325_v5 = vld [vmem:[%s2028_s10 + $0x2e8] sm:$0xff]  ;;  %v315_v53 = vld [vmem:[%s2028_s10 + $0x298] sm:$0xff]  ;;  %v336_v0 = vld [vmem:[%s2028_s10 + $0x340] sm:$0xff] }
  0x30   : > { %962 = vmatmul.mubr.bf16.gmra.mrb[4].mxu1 %v353_v62  ;;  %1688 = vmatprep.subr.bf16.mxu0 %v1868_v11  ;;  %v389_v62 = vpack.c.bf16 %v326_v60, %v319_v59  ;;  %v330_v11 = vld [vmem:[%s2028_s10 + $0x310] sm:$0xff]  ;;  %v329_v56 = vld [vmem:[%s2028_s10 + $0x308] sm:$0xff]  ;;  %v1879_v25 = vld [vmem:[%s2337_s3] sm:$0xff]  }
  0x31   : > { %969 = vmatprep.mubr.bf16.mxu1 %v361_v4  ;;  %v318_v4 = vld [vmem:[%s2028_s10 + $0x2b0] sm:$0xff]  ;;  %v285_v60 = vld [vmem:[%s2028_s10 + $0x1a8] sm:$0xff]  ;;  %1789 = vmatprep.subr.bf16.mxu1 %v1879_v25 }
  0x32   : > { %v388_v9 = vpack.c.bf16 %v325_v5, %v318_v4  ;;  %v278_v59 = vld [vmem:[%s2028_s10 + $0x170] sm:$0xff]  ;;  %v292_v4 = vld [vmem:[%s2028_s10 + $0x1e0] sm:$0xff]  ;;  %v299_v5 = vld [vmem:[%s2028_s10 + $0x218] sm:$0xff] }
  0x33   : > { %1689 = vmatpush3.bf16.msra.mxu0 %v1869_v15  ;;  %v339_v15 = vld [vmem:[%s2028_s10 + $0x358] sm:$0xff]  ;;  %v369_v63 = vpack.c.bf16 %v285_v60, %v278_v59 }
  0x34   : > { %1690 = vmatprep.subr.bf16.mxu0 %v1870_v19  ;;  %v393_v19 = vpack.c.bf16 %v337_v12, %v330_v11  ;;  %v313_v11 = vld [vmem:[%s2028_s10 + $0x288] sm:$0xff] }
  0x35   : > { %v321_v12 = vld [vmem:[%s2028_s10 + $0x2c8] sm:$0xff] }
  0x36   : > { %873 = vmatmul.mubr.bf16.gmra.mrb[8].mxu0 %v358_v10  ;;  %v396_v10 = vpack.c.bf16 %v340_v8, %v333_v7  ;;  %v314_v7 = vld [vmem:[%s2028_s10 + $0x290] sm:$0xff]  ;;  %v376_v8 = vpack.c.bf16 %v299_v5, %v292_v4 }
  0x37   : > { %880 = vmatprep.mubr.bf16.mxu0 %v366_v14  ;;  %1691 = vmatpush3.bf16.msra.mxu0 %v1871_v23  ;;  %v332_v14 = vld [vmem:[%s2028_s10 + $0x320] sm:$0xff] }
  0x38   : > { %970 = vmatmul.mubr.bf16.gmra.mrb[8].mxu1 %v360_v16  ;;  %1692 = vmatprep.subr.bf16.mxu0 %v1873_v31  ;;  %v244_v16 = vld [vmem:[%s2028_s10 + $0x60] sm:$0xff]  ;;  %v395_v21 = vpack.c.bf16 %v339_v15, %v332_v14  ;;  %v266_v31 = vld [vmem:[%s2028_s10 + $0x110] sm:$0xff] }
  0x39   : > { %977 = vmatprep.mubr.bf16.mxu1 %v368_v18  ;;  %v245_v18 = vld [vmem:[%s2028_s10 + $0x68] sm:$0xff]  ;;  %v349_v20 = vpack.c.bf16 %v244_v16, %v237_v13  ;;  %v236_v23 = vld [vmem:[%s2028_s10 + $0x20] sm:$0xff] }
  0x3a   : > { %v350_v22 = vpack.c.bf16 %v245_v18, %v238_v17  ;;  %v328_v13 = vld [vmem:[%s2028_s10 + $0x300] sm:$0xff]  ;;  %v327_v17 = vld [vmem:[%s2028_s10 + $0x2f8] sm:$0xff] }
  0x3b   : > { %1693 = vmatpush3.bf16.msra.mxu0 %v1874_v34  ;;  %v391_v15 = vpack.c.bf16 %v328_v13, %v321_v12  ;;  %v320_v16 = vld [vmem:[%s2028_s10 + $0x2c0] sm:$0xff]  ;;  %v335_v18 = vld [vmem:[%s2028_s10 + $0x338] sm:$0xff] }
  0x3c   : > { %1694 = vmatprep.subr.bf16.mxu0 %v1875_v41  ;;  %v287_v41 = vld [vmem:[%s2028_s10 + $0x1b8] sm:$0xff] }
  0x3d   : > { %v371_v45 = vpack.c.bf16 %v287_v41, %v280_v40 }
  0x3e   : > { %881 = vmatmul.mubr.bf16.gmra.mrb[12].mxu0 %v365_v24  ;;  %v243_v24 = vld [vmem:[%s2028_s10 + $0x58] sm:$0xff] }
  0x3f   : > { %888 = vmatprep.mubr.bf16.mxu0 %v373_v28  ;;  %1695 = vmatpush3.bf16.msra.mxu0 %v1876_v43  ;;  %v348_v27 = vpack.c.bf16 %v243_v24, %v236_v23  ;;  %v252_v28 = vld [vmem:[%s2028_s10 + $0xa0] sm:$0xff]  ;;  %v294_v43 = vld [vmem:[%s2028_s10 + $0x1f0] sm:$0xff]  ;;  %v341_v23 = vld [vmem:[%s2028_s10 + $0x368] sm:$0xff] }
  0x40   : > { %978 = vmatmul.mubr.bf16.gmra.mrb[12].mxu1 %v367_v32  ;;  %1696 = vmatprep.subr.bf16.mxu0 %v1877_v48  ;;  %v273_v32 = vld [vmem:[%s2028_s10 + $0x148] sm:$0xff]  ;;  %v271_v48 = vld [vmem:[%s2028_s10 + $0x138] sm:$0xff] }
  0x41   : > { %985 = vmatprep.mubr.bf16.mxu1 %v375_v33  ;;  %v357_v33 = vpack.c.bf16 %v259_v29, %v252_v28  ;;  %v364_v34 = vpack.c.bf16 %v273_v32, %v266_v31  ;;  %v1882_v28 = vld [vmem:[%s2337_s3 + $0x18] sm:$0xff]   ;;  %v1883_v29 = vld [vmem:[%s2337_s3 + $0x20] sm:$0xff]   ;;  %v1885_v31 = vld [vmem:[%s2337_s3 + $0x30] sm:$0xff]  }
  0x42   : > { %v1886_v32 = vld [vmem:[%s2337_s3 + $0x38] sm:$0xff]  }
  0x43   : > { %1697 = vmatpush3.bf16.msra.mxu0 %v1878_v52  ;;  %v308_v52 = vld [vmem:[%s2028_s10 + $0x260] sm:$0xff] }
  0x44   : > { %v385_v57 = vpack.c.bf16 %v315_v53, %v308_v52 }
  0x46   : > { %889 = vmatmul.mubr.bf16.gmra.mrb[16].mxu0 %v372_v42  ;;  %v363_v42 = vpack.c.bf16 %v272_v38, %v265_v37 }
  0x47   : > { %896 = vmatprep.mubr.bf16.mxu0 %v380_v44  ;;  %v301_v44 = vld [vmem:[%s2028_s10 + $0x228] sm:$0xff] }
  0x48   : > { %986 = vmatmul.mubr.bf16.gmra.mrb[16].mxu1 %v374_v47  ;;  %v378_v46 = vpack.c.bf16 %v301_v44, %v294_v43  ;;  %v264_v47 = vld [vmem:[%s2028_s10 + $0x100] sm:$0xff] }
  0x49   : > { %993 = vmatprep.mubr.bf16.mxu1 %v382_v50  ;;  %v286_v50 = vld [vmem:[%s2028_s10 + $0x1b0] sm:$0xff]  ;;  %v362_v51 = vpack.c.bf16 %v271_v48, %v264_v47 }
  0x4a   : > { %v370_v54 = vpack.c.bf16 %v286_v50, %v279_v49 }
  0x4e   : > { %897 = vmatmul.mubr.bf16.gmra.mrb[20].mxu0 %v379_v55  ;;  %v322_v55 = vld [vmem:[%s2028_s10 + $0x2d0] sm:$0xff] }
  0x4f   : > { %904 = vmatprep.mubr.bf16.mxu0 %v387_v58  ;;  %v392_v58 = vpack.c.bf16 %v329_v56, %v322_v55 }
  0x50   : > { %994 = vmatmul.mubr.bf16.gmra.mrb[20].mxu1 %v381_v61  ;;  %v293_v61 = vld [vmem:[%s2028_s10 + $0x1e8] sm:$0xff] }
  0x51   : > { %1001 = vmatprep.mubr.bf16.mxu1 %v389_v62  ;;  %v300_v62 = vld [vmem:[%s2028_s10 + $0x220] sm:$0xff] }
  0x52   : > { %v377_v2 = vpack.c.bf16 %v300_v62, %v293_v61 }
  0x56   : > { %905 = vmatmul.mubr.bf16.gmra.mrb[24].mxu0 %v386_v3  ;;  %v399_v3 = vpack.c.bf16 %v343_v1, %v336_v0 }
  0x57   : > { %912 = vmatprep.mubr.bf16.mxu0 %v394_v6  ;;  %v307_v6 = vld [vmem:[%s2028_s10 + $0x258] sm:$0xff] }
  0x58   : > { %1002 = vmatmul.mubr.bf16.gmra.mrb[24].mxu1 %v388_v9  ;;  %v384_v9 = vpack.c.bf16 %v314_v7, %v307_v6 }
  0x59   : > { %1009 = vmatprep.mubr.bf16.mxu1 %v396_v10  ;;  %v306_v10 = vld [vmem:[%s2028_s10 + $0x250] sm:$0xff] }
  0x5a   : > { %v383_v14 = vpack.c.bf16 %v313_v11, %v306_v10 }
  0x5e   : > { %913 = vmatmul.mubr.bf16.gmra.mrb[28].mxu0 %v393_v19  ;;  %v342_v19 = vld [vmem:[%s2028_s10 + $0x370] sm:$0xff] }
  0x5f   : > { %1050 = vmatprep.mubr.bf16.mxu0 %v349_v20  ;;  %v390_v20 = vpack.c.bf16 %v327_v17, %v320_v16 }
  0x60   : > { %1010 = vmatmul.mubr.bf16.gmra.mrb[28].mxu1 %v395_v21  ;;  %v398_v21 = vpack.c.bf16 %v342_v19, %v335_v18 }
  0x61   : > { %1773 = vmatprep.mubr.msk.bf16.mxu1 %vm799_vm0, %v350_v22  ;;  %v334_v22 = vld [vmem:[%s2028_s10 + $0x330] sm:$0xff] }
  0x62   : > { %v397_v24 = vpack.c.bf16 %v341_v23, %v334_v22 }
  0x66   : > { %1051 = vmatmul.mubr.bf16.vlgmr.msra.gmra.mrb[32].mxu0 %v348_v27  ;;  %v1881_v27 = vld [vmem:[%s2337_s3 + $0x10] sm:$0xff]  }
  0x67   : > { %1058 = vmatprep.mubr.bf16.mxu0 %v356_v30  ;;  %v1884_v30 = vld [vmem:[%s2337_s3 + $0x28] sm:$0xff]  }
  0x68   : > { %1774 = vmatmul.mubr.msk.bf16.vlgmr.msra.gmra.mrb[32].mxu1 %vm799_vm0, %v357_v33 }
  0x69   : > { %1777 = vmatprep.mubr.msk.bf16.mxu1 %vm799_vm0, %v364_v34  ;;  %1790 = vmatpush3.bf16.msra.mxu1 %v1879_v25  ;;  %v2237_v34 = vld [vmem:[%s2336_s2] ss:$0 sm:$0xff] }
  0x6a   : > { %1791 = vmatprep.subr.bf16.mxu1 %v1880_v26 }
  0x6d   : > { %1792 = vmatpush3.bf16.msra.mxu1 %v1880_v26 }
  0x6e   : > { %1059 = vmatmul.mubr.bf16.gmra.mrb[36].mxu0 %v355_v39  ;;  %1793 = vmatprep.subr.bf16.mxu1 %v1881_v27 }
  0x6f   : > { %1066 = vmatprep.mubr.bf16.mxu0 %v363_v42 }
  0x70   : > { %1778 = vmatmul.mubr.msk.bf16.gmra.mrb[36].mxu1 %vm799_vm0, %v371_v45 }
  0x71   : > { %1781 = vmatprep.mubr.msk.bf16.mxu1 %vm799_vm0, %v378_v46  ;;  %1794 = vmatpush3.bf16.msra.mxu1 %v1881_v27 }
  0x72   : > { %1795 = vmatprep.subr.bf16.mxu1 %v1882_v28 }
  0x75   : > { %1796 = vmatpush3.bf16.msra.mxu1 %v1882_v28 }
  0x76   : > { %1067 = vmatmul.mubr.bf16.gmra.mrb[40].mxu0 %v362_v51  ;;  %1797 = vmatprep.subr.bf16.mxu1 %v1883_v29 }
  0x77   : > { %1074 = vmatprep.mubr.bf16.mxu0 %v370_v54 }
  0x78   : > { %1782 = vmatmul.mubr.msk.bf16.gmra.mrb[40].mxu1 %vm799_vm0, %v385_v57 }
  0x79   : > { %1785 = vmatprep.mubr.msk.bf16.mxu1 %vm799_vm0, %v392_v58  ;;  %1798 = vmatpush3.bf16.msra.mxu1 %v1883_v29 }
  0x7a   : > { %1799 = vmatprep.subr.bf16.mxu1 %v1884_v30 }
  0x7d   : > { %1800 = vmatpush3.bf16.msra.mxu1 %v1884_v30 }
  0x7e   : > { %1075 = vmatmul.mubr.bf16.gmra.mrb[44].mxu0 %v369_v63  ;;  %1801 = vmatprep.subr.bf16.mxu1 %v1885_v31 }
  0x7f   : > { %1082 = vmatprep.mubr.bf16.mxu0 %v377_v2 }
  0x80   : > { %1786 = vmatmul.mubr.msk.bf16.gmra.mrb[44].mxu1 %vm799_vm0, %v399_v3 }
  0x81   : > { %1802 = vmatpush3.bf16.msra.mxu1 %v1885_v31 }
  0x82   : > { %1803 = vmatprep.subr.bf16.mxu1 %v1886_v32 }
  0x85   : > { %1804 = vmatpush3.bf16.msra.mxu1 %v1886_v32 }
  0x86   : > { %1083 = vmatmul.mubr.bf16.gmra.mrb[48].mxu0 %v376_v8 }
  0x87   : > { %1090 = vmatprep.mubr.bf16.mxu0 %v384_v9 }
  0x8e   : > { %1091 = vmatmul.mubr.bf16.gmra.mrb[52].mxu0 %v383_v14 }
  0x8f   : > { %1098 = vmatprep.mubr.bf16.mxu0 %v391_v15 }
  0x96   : > { %1099 = vmatmul.mubr.bf16.gmra.mrb[56].mxu0 %v390_v20 }
  0x97   : > { %1106 = vmatprep.mubr.bf16.mxu0 %v398_v21 }
  0x9e   : > { %1107 = vmatmul.mubr.bf16.gmra.mrb[60].mxu0 %v397_v24 }
  0xf9   : > { %v1570_v33 = vpop.f32.mrb[0].mxu0 }
  0xfa   : > { %v1571_v35 = vpop.f32.mrb[1].mxu0 }
  0xfb   : > { %v1572_v36 = vadd.f32 %v1571_v35, %v1570_v33  ;;  %v1573_v37 = vpop.f32.mrb[2].mxu0  ;;  %v1634_v38 = vpop.f32.mrb[0].mxu1 }
  0xfc   : > { %v1574_v39 = vpop.f32.mrb[3].mxu0  ;;  %v1635_v42 = vpop.f32.mrb[1].mxu1 }
  0xfd   : > { %v859_v40 = vadd.f32 %v1572_v36, %v2237_v34  ;;  %v1575_v41 = vadd.f32 %v1574_v39, %v1573_v37  ;;  %v1636_v43 = vadd.f32 %v1635_v42, %v1634_v38  ;;  %v1637_v44 = vpop.f32.mrb[2].mxu1 }
  0xfe   : > { %v1638_v46 = vpop.f32.mrb[3].mxu1 }
  0xff   : > { %v862_v45 = vadd.f32 %v1575_v41, %v2237_v34  ;;  %v2241_v47 = vadd.f32 %v1636_v43, %v859_v40  ;;  %v1639_v48 = vadd.f32 %v1638_v46, %v1637_v44 }
 0x101   : > { %v1576_v49 = vpop.f32.mrb[4].mxu0  ;;  %v2243_v50 = vadd.f32 %v1639_v48, %v862_v45 }
 0x102   : > { %v1577_v51 = vpop.f32.mrb[5].mxu0 }
 0x103   : > { %v1578_v52 = vadd.f32 %v1577_v51, %v1576_v49  ;;  %v1579_v53 = vpop.f32.mrb[6].mxu0  ;;  %v1640_v54 = vpop.f32.mrb[4].mxu1 }
 0x104   : > { %v1580_v55 = vpop.f32.mrb[7].mxu0  ;;  %v1641_v58 = vpop.f32.mrb[5].mxu1 }
 0x105   : > { %v867_v56 = vadd.f32 %v1578_v52, %v2237_v34  ;;  %v1581_v57 = vadd.f32 %v1580_v55, %v1579_v53  ;;  %v1642_v59 = vadd.f32 %v1641_v58, %v1640_v54  ;;  %v1643_v60 = vpop.f32.mrb[6].mxu1 }
 0x106   : > { %v1644_v62 = vpop.f32.mrb[7].mxu1 }
 0x107   : > { %v870_v61 = vadd.f32 %v1581_v57, %v2237_v34  ;;  %v2247_v63 = vadd.f32 %v1642_v59, %v867_v56  ;;  %v1645_v0 = vadd.f32 %v1644_v62, %v1643_v60 }
 0x109   : > { %v1582_v1 = vpop.f32.mrb[8].mxu0  ;;  %v2249_v2 = vadd.f32 %v1645_v0, %v870_v61 }
 0x10a   : > { %v1583_v3 = vpop.f32.mrb[9].mxu0 }
 0x10b   : > { %v1584_v4 = vadd.f32 %v1583_v3, %v1582_v1  ;;  %v1585_v5 = vpop.f32.mrb[10].mxu0  ;;  %v1646_v6 = vpop.f32.mrb[8].mxu1 }
 0x10c   : > { %v1586_v7 = vpop.f32.mrb[11].mxu0  ;;  %v1647_v10 = vpop.f32.mrb[9].mxu1 }
 0x10d   : > { %v875_v8 = vadd.f32 %v1584_v4, %v2237_v34  ;;  %v1587_v9 = vadd.f32 %v1586_v7, %v1585_v5  ;;  %v1648_v11 = vadd.f32 %v1647_v10, %v1646_v6  ;;  %v1649_v12 = vpop.f32.mrb[10].mxu1 }
 0x10e   : > { %v1650_v14 = vpop.f32.mrb[11].mxu1 }
 0x10f   : > { %v878_v13 = vadd.f32 %v1587_v9, %v2237_v34  ;;  %v2253_v15 = vadd.f32 %v1648_v11, %v875_v8  ;;  %v1651_v16 = vadd.f32 %v1650_v14, %v1649_v12 }
 0x111   : > { %v1588_v17 = vpop.f32.mrb[12].mxu0  ;;  %v2255_v18 = vadd.f32 %v1651_v16, %v878_v13 }
 0x112   : > { %v1589_v19 = vpop.f32.mrb[13].mxu0 }
 0x113   : > { %v1590_v20 = vadd.f32 %v1589_v19, %v1588_v17  ;;  %v1591_v21 = vpop.f32.mrb[14].mxu0  ;;  %v1652_v22 = vpop.f32.mrb[12].mxu1 }
 0x114   : > { %v1592_v23 = vpop.f32.mrb[15].mxu0  ;;  %v1653_v26 = vpop.f32.mrb[13].mxu1 }
 0x115   : > { %v883_v24 = vadd.f32 %v1590_v20, %v2237_v34  ;;  %v1593_v25 = vadd.f32 %v1592_v23, %v1591_v21  ;;  %v1654_v27 = vadd.f32 %v1653_v26, %v1652_v22  ;;  %v1655_v28 = vpop.f32.mrb[14].mxu1 }
 0x116   : > { %v1656_v30 = vpop.f32.mrb[15].mxu1 }
 0x117   : > { %v886_v29 = vadd.f32 %v1593_v25, %v2237_v34  ;;  %v2259_v31 = vadd.f32 %v1654_v27, %v883_v24  ;;  %v1657_v32 = vadd.f32 %v1656_v30, %v1655_v28 }
 0x119   : > { %v1594_v33 = vpop.f32.mrb[16].mxu0  ;;  %v2261_v35 = vadd.f32 %v1657_v32, %v886_v29 }
 0x11a   : > { %v1595_v36 = vpop.f32.mrb[17].mxu0 }
 0x11b   : > { %v1596_v37 = vadd.f32 %v1595_v36, %v1594_v33  ;;  %v1597_v38 = vpop.f32.mrb[18].mxu0  ;;  %v1658_v39 = vpop.f32.mrb[16].mxu1 }
 0x11c   : > { %v1598_v40 = vpop.f32.mrb[19].mxu0  ;;  %v1659_v43 = vpop.f32.mrb[17].mxu1 }
 0x11d   : > { %v891_v41 = vadd.f32 %v1596_v37, %v2237_v34  ;;  %v1599_v42 = vadd.f32 %v1598_v40, %v1597_v38  ;;  %v1660_v44 = vadd.f32 %v1659_v43, %v1658_v39  ;;  %v1661_v45 = vpop.f32.mrb[18].mxu1 }
 0x11e   : > { %v1662_v48 = vpop.f32.mrb[19].mxu1 }
 0x11f   : > { %v894_v46 = vadd.f32 %v1599_v42, %v2237_v34  ;;  %v2265_v49 = vadd.f32 %v1660_v44, %v891_v41  ;;  %v1663_v51 = vadd.f32 %v1662_v48, %v1661_v45 }
 0x121   : > { %v1600_v52 = vpop.f32.mrb[20].mxu0  ;;  %v2267_v53 = vadd.f32 %v1663_v51, %v894_v46 }
 0x122   : > { %v1601_v54 = vpop.f32.mrb[21].mxu0 }
 0x123   : > { %v1602_v55 = vadd.f32 %v1601_v54, %v1600_v52  ;;  %v1603_v56 = vpop.f32.mrb[22].mxu0  ;;  %v1664_v57 = vpop.f32.mrb[20].mxu1 }
 0x124   : > { %v1604_v58 = vpop.f32.mrb[23].mxu0  ;;  %v1665_v61 = vpop.f32.mrb[21].mxu1 }
 0x125   : > { %v899_v59 = vadd.f32 %v1602_v55, %v2237_v34  ;;  %v1605_v60 = vadd.f32 %v1604_v58, %v1603_v56  ;;  %v1666_v62 = vadd.f32 %v1665_v61, %v1664_v57  ;;  %v1667_v0 = vpop.f32.mrb[22].mxu1 }
 0x126   : > { %v1668_v3 = vpop.f32.mrb[23].mxu1 }
 0x127   : > { %v902_v1 = vadd.f32 %v1605_v60, %v2237_v34  ;;  %v2271_v4 = vadd.f32 %v1666_v62, %v899_v59  ;;  %v1669_v5 = vadd.f32 %v1668_v3, %v1667_v0 }
 0x129   : > { %v1606_v6 = vpop.f32.mrb[24].mxu0  ;;  %v2273_v7 = vadd.f32 %v1669_v5, %v902_v1 }
 0x12a   : > { %v1607_v8 = vpop.f32.mrb[25].mxu0 }
 0x12b   : > { %v1608_v9 = vadd.f32 %v1607_v8, %v1606_v6  ;;  %v1609_v10 = vpop.f32.mrb[26].mxu0  ;;  %v1670_v11 = vpop.f32.mrb[24].mxu1 }
 0x12c   : > { %v1610_v12 = vpop.f32.mrb[27].mxu0  ;;  %v1671_v16 = vpop.f32.mrb[25].mxu1 }
 0x12d   : > { %v907_v13 = vadd.f32 %v1608_v9, %v2237_v34  ;;  %v1611_v14 = vadd.f32 %v1610_v12, %v1609_v10  ;;  %v1672_v17 = vadd.f32 %v1671_v16, %v1670_v11  ;;  %v1673_v19 = vpop.f32.mrb[26].mxu1 }
 0x12e   : > { %v1674_v21 = vpop.f32.mrb[27].mxu1 }
 0x12f   : > { %v910_v20 = vadd.f32 %v1611_v14, %v2237_v34  ;;  %v2277_v22 = vadd.f32 %v1672_v17, %v907_v13  ;;  %v1675_v23 = vadd.f32 %v1674_v21, %v1673_v19 }
 0x131   : > { %v1612_v24 = vpop.f32.mrb[28].mxu0  ;;  %v2279_v25 = vadd.f32 %v1675_v23, %v910_v20 }
 0x132   : > { %v1613_v26 = vpop.f32.mrb[29].mxu0 }
 0x133   : > { %v1614_v27 = vadd.f32 %v1613_v26, %v1612_v24  ;;  %v1615_v28 = vpop.f32.mrb[30].mxu0  ;;  %v1676_v29 = vpop.f32.mrb[28].mxu1 }
 0x134   : > { %v1616_v30 = vpop.f32.mrb[31].mxu0  ;;  %v1677_v36 = vpop.f32.mrb[29].mxu1 }
 0x135   : > { %v915_v32 = vadd.f32 %v1614_v27, %v2237_v34  ;;  %v1617_v33 = vadd.f32 %v1616_v30, %v1615_v28  ;;  %v1678_v37 = vadd.f32 %v1677_v36, %v1676_v29  ;;  %v1679_v38 = vpop.f32.mrb[30].mxu1 }
 0x136   : > { %v1680_v40 = vpop.f32.mrb[31].mxu1 }
 0x137   : > { %v918_v39 = vadd.f32 %v1617_v33, %v2237_v34  ;;  %v2283_v41 = vadd.f32 %v1678_v37, %v915_v32  ;;  %v1681_v42 = vadd.f32 %v1680_v40, %v1679_v38 }
 0x139   : > { %v1698_v43 = vpop.f32.mrb[32].mxu0  ;;  %v2285_v44 = vadd.f32 %v1681_v42, %v918_v39 }
 0x13a   : > { %v1699_v45 = vpop.f32.mrb[33].mxu0 }
 0x13b   : > { %v1700_v46 = vadd.f32 %v1699_v45, %v1698_v43  ;;  %v1701_v48 = vpop.f32.mrb[34].mxu0  ;;  %v1775_v52 = vpop.f32.mrb[32].mxu1 }
 0x13c   : > { %v1702_v51 = vpop.f32.mrb[35].mxu0  ;;  %v1149_v56 = vpop.f32.mrb[33].mxu1 }
 0x13d   : > { %v1703_v54 = vadd.f32 %v1702_v51, %v1701_v48  ;;  %v1053_v55 = vadd.f32 %v1700_v46, %v2241_v47  ;;  %v1776_v57 = vpop.f32.mrb[34].mxu1 }
 0x13e   : > { %v1152_v59 = vpop.f32.mrb[35].mxu1 }
 0x13f   : > { %v1150_v58 = vadd.f32 %v1149_v56, %v1053_v55  ;;  %v1056_v34 = vadd.f32 %v1703_v54, %v2243_v50 }
 0x141   : > { %v1153_v60 = vadd.f32 %v1152_v59, %v1056_v34  ;;  %v1704_v61 = vpop.f32.mrb[36].mxu0  ;;  %v1212_v0 = vmax.f32 %v1150_v58, 0.0 }
 0x142   : > { %v1705_v62 = vpop.f32.mrb[37].mxu0 }
 0x143   : > { %v1213_v1 = vmax.f32 %v1153_v60, 0.0  ;;  %v1706_v3 = vadd.f32 %v1705_v62, %v1704_v61  ;;  %v1707_v5 = vpop.f32.mrb[38].mxu0  ;;  %v1779_v8 = vpop.f32.mrb[36].mxu1 }
 0x144   : > { %v1708_v6 = vpop.f32.mrb[39].mxu0  ;;  %v1165_v47 = vpop.f32.mrb[37].mxu1 }
 0x145   : > { %v1228_v9 = vpack.c.bf16 %v1213_v1, %v1212_v0  ;;  %v1061_v10 = vadd.f32 %v1706_v3, %v2247_v63  ;;  %v1709_v11 = vadd.f32 %v1708_v6, %v1707_v5  ;;  %v1780_v12 = vpop.f32.mrb[38].mxu1 }
 0x146   : > { %v1168_v50 = vpop.f32.mrb[39].mxu1 }
 0x147   : > { %v1158_v13 = vadd.f32 %v1775_v52, %v1061_v10  ;;  %v1064_v14 = vadd.f32 %v1709_v11, %v2249_v2  ;;  %1805 = vmatprep.mubr.bf16.mxu1 %v1228_v9 }
 0x149   : > { %v1161_v16 = vadd.f32 %v1776_v57, %v1064_v14  ;;  %v1710_v17 = vpop.f32.mrb[40].mxu0  ;;  %v1214_v20 = vmax.f32 %v1158_v13, 0.0 }
 0x14a   : > { %v1711_v19 = vpop.f32.mrb[41].mxu0 }
 0x14b   : > { %v1215_v21 = vmax.f32 %v1161_v16, 0.0  ;;  %v1712_v23 = vadd.f32 %v1711_v19, %v1710_v17  ;;  %v1713_v24 = vpop.f32.mrb[42].mxu0  ;;  %v1783_v27 = vpop.f32.mrb[40].mxu1 }
 0x14c   : > { %v1714_v26 = vpop.f32.mrb[43].mxu0  ;;  %v1181_v30 = vpop.f32.mrb[41].mxu1 }
 0x14d   : > { %v1229_v28 = vpack.c.bf16 %v1215_v21, %v1214_v20  ;;  %v1715_v29 = vadd.f32 %v1714_v26, %v1713_v24  ;;  %v1069_v63 = vadd.f32 %v1712_v23, %v2253_v15  ;;  %v1784_v32 = vpop.f32.mrb[42].mxu1 }
 0x14e   : > { %v1184_v36 = vpop.f32.mrb[43].mxu1 }
 0x14f   : > { %v1166_v33 = vadd.f32 %v1165_v47, %v1069_v63  ;;  %1806 = vmatmul.mubr.bf16.vlgmr.msra.gmra.mrb[48].mxu1 %v1229_v28  ;;  %v1072_v2 = vadd.f32 %v1715_v29, %v2255_v18 }
 0x151   : > { %v1169_v37 = vadd.f32 %v1168_v50, %v1072_v2  ;;  %v1716_v38 = vpop.f32.mrb[44].mxu0  ;;  %v1216_v40 = vmax.f32 %v1166_v33, 0.0 }
 0x152   : > { %v1717_v39 = vpop.f32.mrb[45].mxu0 }
 0x153   : > { %v1217_v42 = vmax.f32 %v1169_v37, 0.0  ;;  %v1718_v43 = vadd.f32 %v1717_v39, %v1716_v38  ;;  %v1719_v45 = vpop.f32.mrb[46].mxu0  ;;  %v2293_v48 = vpop.f32.mrb[44].mxu1 }
 0x154   : > { %v1720_v46 = vpop.f32.mrb[47].mxu0  ;;  %v1197_v54 = vpop.f32.mrb[45].mxu1 }
 0x155   : > { %v1230_v51 = vpack.c.bf16 %v1217_v42, %v1216_v40  ;;  %v1077_v15 = vadd.f32 %v1718_v43, %v2259_v31  ;;  %v1721_v52 = vadd.f32 %v1720_v46, %v1719_v45  ;;  %v1788_v55 = vpop.f32.mrb[46].mxu1 }
 0x156   : > { %v1200_v57 = vpop.f32.mrb[47].mxu1 }
 0x157   : > { %v1174_v56 = vadd.f32 %v1779_v8, %v1077_v15  ;;  %v1080_v18 = vadd.f32 %v1721_v52, %v2261_v35  ;;  %1809 = vmatprep.mubr.bf16.mxu1 %v1230_v51 }
 0x159   : > { %v1177_v58 = vadd.f32 %v1780_v12, %v1080_v18  ;;  %v1722_v34 = vpop.f32.mrb[48].mxu0  ;;  %v1218_v60 = vmax.f32 %v1174_v56, 0.0 }
 0x15a   : > { %v1723_v59 = vpop.f32.mrb[49].mxu0 }
 0x15b   : > { %v1219_v61 = vmax.f32 %v1177_v58, 0.0  ;;  %v1724_v62 = vadd.f32 %v1723_v59, %v1722_v34  ;;  %v1725_v0 = vpop.f32.mrb[50].mxu0 }
 0x15c   : > { %v1726_v1 = vpop.f32.mrb[51].mxu0 }
 0x15d   : > { %v1727_v3 = vadd.f32 %v1726_v1, %v1725_v0  ;;  %v1085_v5 = vadd.f32 %v1724_v62, %v2265_v49  ;;  %v1231_v31 = vpack.c.bf16 %v1219_v61, %v1218_v60 }
 0x15f   : > { %v1182_v6 = vadd.f32 %v1181_v30, %v1085_v5  ;;  %1810 = vmatmul.mubr.bf16.gmra.mrb[52].mxu1 %v1231_v31  ;;  %v1088_v8 = vadd.f32 %v1727_v3, %v2267_v53 }
 0x161   : > { %v1185_v9 = vadd.f32 %v1184_v36, %v1088_v8  ;;  %v1728_v35 = vpop.f32.mrb[52].mxu0  ;;  %v1220_v11 = vmax.f32 %v1182_v6, 0.0 }
 0x162   : > { %v1729_v10 = vpop.f32.mrb[53].mxu0 }
 0x163   : > { %v1221_v47 = vmax.f32 %v1185_v9, 0.0  ;;  %v1730_v12 = vadd.f32 %v1729_v10, %v1728_v35  ;;  %v1731_v13 = vpop.f32.mrb[54].mxu0 }
 0x164   : > { %v1732_v14 = vpop.f32.mrb[55].mxu0 }
 0x165   : > { %v1232_v50 = vpack.c.bf16 %v1221_v47, %v1220_v11  ;;  %v1093_v16 = vadd.f32 %v1730_v12, %v2271_v4  ;;  %v1733_v17 = vadd.f32 %v1732_v14, %v1731_v13 }
 0x167   : > { %v1190_v19 = vadd.f32 %v1783_v27, %v1093_v16  ;;  %v1096_v49 = vadd.f32 %v1733_v17, %v2273_v7  ;;  %1813 = vmatprep.mubr.bf16.mxu1 %v1232_v50 }
 0x169   : > { %v1193_v20 = vadd.f32 %v1784_v32, %v1096_v49  ;;  %v1734_v21 = vpop.f32.mrb[56].mxu0  ;;  %v1222_v53 = vmax.f32 %v1190_v19, 0.0 }
 0x16a   : > { %v1735_v23 = vpop.f32.mrb[57].mxu0 }
 0x16b   : > { %v1223_v24 = vmax.f32 %v1193_v20, 0.0  ;;  %v1736_v26 = vadd.f32 %v1735_v23, %v1734_v21  ;;  %v1737_v28 = vpop.f32.mrb[58].mxu0 }
 0x16c   : > { %v1738_v29 = vpop.f32.mrb[59].mxu0 }
 0x16d   : > { %v1739_v63 = vadd.f32 %v1738_v29, %v1737_v28  ;;  %v1101_v30 = vadd.f32 %v1736_v26, %v2277_v22  ;;  %v1233_v33 = vpack.c.bf16 %v1223_v24, %v1222_v53 }
 0x16f   : > { %v1198_v2 = vadd.f32 %v1197_v54, %v1101_v30  ;;  %1814 = vmatmul.mubr.bf16.gmra.mrb[56].mxu1 %v1233_v33  ;;  %v1104_v4 = vadd.f32 %v1739_v63, %v2279_v25  ;;  %v1543_v54 = vld [vmem:[%s2338_s4] ss:$0 sm:$0xff] }
 0x171   : > { %v1201_v27 = vadd.f32 %v1200_v57, %v1104_v4  ;;  %v1740_v36 = vpop.f32.mrb[60].mxu0  ;;  %v1224_v37 = vmax.f32 %v1198_v2, 0.0 }
 0x172   : > { %v1741_v7 = vpop.f32.mrb[61].mxu0 }
 0x173   : > { %v1225_v32 = vmax.f32 %v1201_v27, 0.0  ;;  %v1742_v38 = vadd.f32 %v1741_v7, %v1740_v36  ;;  %v1743_v39 = vpop.f32.mrb[62].mxu0 }
 0x174   : > { %v1744_v40 = vpop.f32.mrb[63].mxu0 }
 0x175   : > { %v1234_v42 = vpack.c.bf16 %v1225_v32, %v1224_v37  ;;  %v1109_v43 = vadd.f32 %v1742_v38, %v2283_v41  ;;  %v1745_v45 = vadd.f32 %v1744_v40, %v1743_v39 }
 0x177   : > { %v1206_v22 = vadd.f32 %v2293_v48, %v1109_v43  ;;  %v1112_v46 = vadd.f32 %v1745_v45, %v2285_v44  ;;  %1817 = vmatprep.mubr.bf16.mxu1 %v1234_v42 }
 0x179   : > { %v1209_v51 = vadd.f32 %v1788_v55, %v1112_v46  ;;  %v1226_v25 = vmax.f32 %v1206_v22, 0.0 }
 0x17b   : > { %v1227_v15 = vmax.f32 %v1209_v51, 0.0 }
 0x17d   : > { %v1235_v52 = vpack.c.bf16 %v1227_v15, %v1226_v25 }
 0x17f   : > { %1818 = vmatmul.mubr.bf16.gmra.mrb[60].mxu1 %v1235_v52 }
 0x222   : > { %v1807_v41 = vpop.f32.mrb[48].mxu1 }
 0x223   : > { %v1350_v44 = vadd.f32 %v1807_v41, %v1543_v54  ;;  %v1341_v48 = vpop.f32.mrb[49].mxu1 }
 0x224   : > { %v1342_v55 = vadd.f32 %v1543_v54, %v1341_v48  ;;  %v1808_v56 = vpop.f32.mrb[50].mxu1 }
 0x225   : > { %1406 = vst [vmem:[%s2313_s7 + $0x10] sm:$0xff] %v1350_v44  ;;  %v1353_v18 = vadd.f32 %v1808_v56, %v1543_v54  ;;  %v1344_v57 = vpop.f32.mrb[51].mxu1 }
 0x226   : > { %1404 = vst [vmem:[%s2313_s7] sm:$0xff] %v1342_v55  ;;  %v1345_v58 = vadd.f32 %v1543_v54, %v1344_v57 }
 0x227   : > { %1407 = vst [vmem:[%s2313_s7 + $0x18] sm:$0xff] %v1353_v18 }
 0x228   : > { %1405 = vst [vmem:[%s2313_s7 + $0x8] sm:$0xff] %v1345_v58 }
 0x232   : > { %v1811_v34 = vpop.f32.mrb[52].mxu1 }
 0x233   : > { %v1366_v59 = vadd.f32 %v1811_v34, %v1543_v54  ;;  %v1357_v60 = vpop.f32.mrb[53].mxu1 }
 0x234   : > { %v1358_v61 = vadd.f32 %v1543_v54, %v1357_v60  ;;  %v1812_v62 = vpop.f32.mrb[54].mxu1 }
 0x235   : > { %1410 = vst [vmem:[%s2313_s7 + $0x30] sm:$0xff] %v1366_v59  ;;  %v1369_v0 = vadd.f32 %v1812_v62, %v1543_v54  ;;  %v1360_v1 = vpop.f32.mrb[55].mxu1 }
 0x236   : > { %1408 = vst [vmem:[%s2313_s7 + $0x20] sm:$0xff] %v1358_v61  ;;  %v1361_v3 = vadd.f32 %v1543_v54, %v1360_v1 }
 0x237   : > { %1411 = vst [vmem:[%s2313_s7 + $0x38] sm:$0xff] %v1369_v0 }
 0x238   : > { %1409 = vst [vmem:[%s2313_s7 + $0x28] sm:$0xff] %v1361_v3 }
 0x242   : > { %v1815_v5 = vpop.f32.mrb[56].mxu1 }
 0x243   : > { %v1382_v31 = vadd.f32 %v1815_v5, %v1543_v54  ;;  %v1373_v6 = vpop.f32.mrb[57].mxu1 }
 0x244   : > { %v1374_v8 = vadd.f32 %v1543_v54, %v1373_v6  ;;  %v1816_v9 = vpop.f32.mrb[58].mxu1 }
 0x245   : > { %1414 = vst [vmem:[%s2313_s7 + $0x50] sm:$0xff] %v1382_v31  ;;  %v1385_v35 = vadd.f32 %v1816_v9, %v1543_v54  ;;  %v1376_v10 = vpop.f32.mrb[59].mxu1 }
 0x246   : > { %1412 = vst [vmem:[%s2313_s7 + $0x40] sm:$0xff] %v1374_v8  ;;  %v1377_v11 = vadd.f32 %v1543_v54, %v1376_v10 }
 0x247   : > { %1415 = vst [vmem:[%s2313_s7 + $0x58] sm:$0xff] %v1385_v35 }
 0x248   : > { %1413 = vst [vmem:[%s2313_s7 + $0x48] sm:$0xff] %v1377_v11 }
 0x252   : > { %v1819_v47 = vpop.f32.mrb[60].mxu1 }
 0x253   : > { %v1398_v12 = vadd.f32 %v1819_v47, %v1543_v54  ;;  %v1389_v13 = vpop.f32.mrb[61].mxu1 }
 0x254   : > { %v1390_v14 = vadd.f32 %v1543_v54, %v1389_v13  ;;  %v1820_v50 = vpop.f32.mrb[62].mxu1 }
 0x255   : > { %1418 = vst [vmem:[%s2313_s7 + $0x70] sm:$0xff] %v1398_v12  ;;  %v1401_v16 = vadd.f32 %v1820_v50, %v1543_v54  ;;  %v1392_v17 = vpop.f32.mrb[63].mxu1 }
 0x256   : > { %1416 = vst [vmem:[%s2313_s7 + $0x60] sm:$0xff] %v1390_v14  ;;  %v1393_v19 = vadd.f32 %v1543_v54, %v1392_v17 }
 0x257   : > { %1419 = vst [vmem:[%s2313_s7 + $0x78] sm:$0xff] %v1401_v16 }
 0x258   : > { %1417 = vst [vmem:[%s2313_s7 + $0x68] sm:$0xff] %v1393_v19 }
 0x259 PF: > { %s15_s18 = sadd.s32 1, %s1893_s18  }
 0x25a   : > { %p12_p4 = scmp.ge.s32.totalorder %s15_s18, 4  }
 0x25c   :  { %14 = sbr.rel (!%p12_p4) target bundleno = 1 (0x1), region = 70 }

</bundles_post_ra>
